<compile_context>
chip_gen: v7x
topology: tpu7x:2x2x1
jax: 0.10.0
libtpu: 0.0.40
codegen_flags: <defaults>
</compile_context>

<pallas_src>
import functools

import jax
import jax.numpy as jnp
from jax.experimental import pallas as pl
from jax.experimental.pallas import tpu as pltpu


def _round_up(x: int, m: int) -> int:
    return ((x + m - 1) // m) * m


def _vmem_capacity_bytes() -> int:
    try:
        return int(pltpu.get_tpu_info().vmem_capacity_bytes)
    except Exception:
        return 64 * 1024 * 1024  # conservative default (v7x per-TensorCore)


def prepare_encoder_params(v, g, b):
    """One-time (load-time) parameter prep.

    v: (embed_size, img_dim) weight-norm direction, g: scalar, b: (embed_size,).
    Returns (w_prep, b_prep, embed_size):
      w_prep: (Dp, Ep) bf16, == transpose of zero-padded (g/||V||_F) * V
      b_prep: (1, Ep)  f32 zero-padded bias
    """
    embed_size, img_dim = v.shape
    v32 = v.astype(jnp.float32)
    scale = jnp.asarray(g, jnp.float32) / jnp.sqrt(jnp.sum(v32 * v32))
    w_eff = v32 * scale                                   # (E, D) effective weight
    dp = _round_up(img_dim, 128)
    ep = _round_up(embed_size, 128)
    w_prep = jnp.pad(w_eff, ((0, ep - embed_size), (0, dp - img_dim))).T
    w_prep = w_prep.astype(jnp.bfloat16)                  # (Dp, Ep), MXU-ready
    b_prep = jnp.pad(b.astype(jnp.float32), (0, ep - embed_size)).reshape(1, ep)
    return w_prep, b_prep, embed_size


def _resident_kernel(x_ref, w_ref, b_ref, o_ref, *, no_imgnorm):
    # x_ref: (tm, Dp), w_ref: (Dp, Ep) bf16 resident, b_ref: (1, Ep) f32.
    f = jax.lax.dot_general(
        x_ref[...].astype(jnp.bfloat16), w_ref[...],
        dimension_numbers=(((1,), (0,)), ((), ())),
        preferred_element_type=jnp.float32)
    f = f + b_ref[...]
    if not no_imgnorm:
        ss = jnp.sum(f * f, axis=-1, keepdims=True)       # (tm, 1)
        f = f * jax.lax.rsqrt(ss + 1e-16)                 # ~ 1/(sqrt(ss)+1e-8)
    o_ref[...] = f.astype(o_ref.dtype)


def _ktiled_kernel(x_ref, w_ref, b_ref, o_ref, acc_ref, *, no_imgnorm):
    # Grid: (row tiles, K tiles). Weight streams in (tk, Ep) slabs.
    k = pl.program_id(1)

    @pl.when(k == 0)
    def _():
        acc_ref[...] = jnp.zeros_like(acc_ref)

    acc_ref[...] += jax.lax.dot_general(
        x_ref[...].astype(jnp.bfloat16), w_ref[...],
        dimension_numbers=(((1,), (0,)), ((), ())),
        preferred_element_type=jnp.float32)

    @pl.when(k == pl.num_programs(1) - 1)
    def _():
        f = acc_ref[...] + b_ref[...]
        if not no_imgnorm:
            ss = jnp.sum(f * f, axis=-1, keepdims=True)
            f = f * jax.lax.rsqrt(ss + 1e-16)
        o_ref[...] = f.astype(o_ref.dtype)


def encoder_image_forward(images, w_prep, b_prep, embed_size, *,
                          no_imgnorm=False, tm=None, weight_vmem_cap_bytes=None):
    """images: (..., img_dim); w_prep/b_prep from prepare_encoder_params."""
    img_dim = images.shape[-1]
    lead_shape = images.shape[:-1]
    dp, ep = w_prep.shape
    assert dp == _round_up(img_dim, 128) and ep == _round_up(embed_size, 128)

    x2d = images.reshape(-1, img_dim)
    n_rows = x2d.shape[0]

    # Last-dim zero pad only when needed; fuse the bf16 cast into the same copy.
    # (Contraction-dim padding must be explicit zeros; OOB reads are not zero.)
    if img_dim != dp:
        x_in = jnp.pad(x2d, ((0, 0), (0, dp - img_dim))).astype(jnp.bfloat16)
    else:
        x_in = x2d                         # streamed as-is; tile cast in-kernel
    x_item = jnp.dtype(x_in.dtype).itemsize
    out_dtype = images.dtype
    out_item = jnp.dtype(out_dtype).itemsize
    w_item = jnp.dtype(w_prep.dtype).itemsize

    # Per-generation VMEM budgeting.
    vmem_cap = _vmem_capacity_bytes()
    big_vmem = vmem_cap >= 100 * 1024 * 1024          # v5e/v6e (128 MiB) vs v7x (64 MiB)
    budget = (28 if big_vmem else 24) * 1024 * 1024
    tm_cap = 512 if big_vmem else 256
    if weight_vmem_cap_bytes is None:
        weight_vmem_cap_bytes = (budget * 3) // 5

    # Grid-invariant weight is still double-buffered by the default pipeline.
    w_resident_bytes = 2 * dp * ep * w_item
    use_k_tiling = w_resident_bytes > weight_vmem_cap_bytes

    if not use_k_tiling:
        if tm is None:
            fixed = w_resident_bytes + 2 * ep * 4
            per_row = 2 * (dp * x_item + ep * out_item)
            tm = max((budget - fixed) // max(per_row, 1), 8)
            tm = min(tm_cap, (tm // 8) * 8)
        tm = int(max(8, min(_round_up(int(tm), 8),
                            _round_up(max(n_rows, 1), 8), tm_cap)))
        grid = (pl.cdiv(n_rows, tm),)
        vmem_est = (w_resident_bytes + 2 * ep * 4
                    + 2 * tm * dp * x_item + 2 * tm * ep * out_item)
        kernel = functools.partial(_resident_kernel, no_imgnorm=no_imgnorm)
        in_specs = [
            pl.BlockSpec((tm, dp), lambda i: (i, 0)),       # streaming row tiles
            pl.BlockSpec((dp, ep), lambda i: (0, 0)),       # grid-invariant weight
            pl.BlockSpec((1, ep), lambda i: (0, 0)),        # grid-invariant bias
        ]
        out_specs = pl.BlockSpec((tm, ep), lambda i: (i, 0))
        scratch_shapes = ()
        dim_sem = ("parallel",)
    else:
        # Pick tk: largest 128-multiple divisor of Dp whose double-buffered
        # weight slab fits the weight budget.
        n128 = dp // 128
        tk = 128
        for m in range(1, n128 + 1):
            if n128 % m == 0 and 2 * (dp // m) * ep * w_item <= weight_vmem_cap_bytes:
                tk = dp // m
                break
        n_k = dp // tk
        if tm is None:
            fixed = 2 * tk * ep * w_item + 2 * ep * 4
            per_row = 2 * tk * x_item + 2 * ep * out_item + ep * 4  # + acc scratch
            tm = max((budget - fixed) // max(per_row, 1), 8)
            tm = min(tm_cap, (tm // 8) * 8)
        tm = int(max(8, min(_round_up(int(tm), 8),
                            _round_up(max(n_rows, 1), 8), tm_cap)))
        grid = (pl.cdiv(n_rows, tm), n_k)
        vmem_est = (2 * tk * ep * w_item + 2 * ep * 4
                    + 2 * tm * tk * x_item + 2 * tm * ep * out_item
                    + tm * ep * 4)
        kernel = functools.partial(_ktiled_kernel, no_imgnorm=no_imgnorm)
        in_specs = [
            pl.BlockSpec((tm, tk), lambda i, k: (i, k)),
            pl.BlockSpec((tk, ep), lambda i, k: (k, 0)),    # streamed weight slabs
            pl.BlockSpec((1, ep), lambda i, k: (0, 0)),
        ]
        out_specs = pl.BlockSpec((tm, ep), lambda i, k: (i, 0))
        scratch_shapes = (pltpu.VMEM((tm, ep), jnp.float32),)
        dim_sem = ("parallel", "arbitrary")

    # Always set the scoped VMEM limit (v5e default is only 16 MiB), but keep
    # it below physical capacity.
    vmem_limit = int(min(max(vmem_est + (8 << 20), 32 << 20), int(vmem_cap * 0.9)))
    compiler_params = pltpu.CompilerParams(
        dimension_semantics=dim_sem, vmem_limit_bytes=vmem_limit)

    cost = pl.CostEstimate(
        flops=int(2 * n_rows * dp * ep),
        transcendentals=int(0 if no_imgnorm else n_rows),
        bytes_accessed=int(n_rows * dp * x_item + dp * ep * w_item
                           + ep * 4 + n_rows * ep * out_item),
    )

    out_p = pl.pallas_call(
        kernel,
        out_shape=jax.ShapeDtypeStruct((n_rows, ep), out_dtype),
        grid_spec=pltpu.PrefetchScalarGridSpec(
            num_scalar_prefetch=0,
            grid=grid,
            in_specs=in_specs,
            out_specs=out_specs,
            scratch_shapes=scratch_shapes,
        ),
        compiler_params=compiler_params,
        cost_estimate=cost,
    )(x_in, w_prep, b_prep)

    out2d = out_p if ep == embed_size else out_p[:, :embed_size]
    return out2d.reshape(*lead_shape, embed_size)


# ----------------------------- references ----------------------------------

def reference_forward_f32(images, v, g, b, *, no_imgnorm=False):
    # Exact PyTorch-semantics reference in f32.
    v32 = v.astype(jnp.float32)
    scale = jnp.asarray(g, jnp.float32) / jnp.sqrt(jnp.sum(v32 * v32))
    w_eff = scale * v32
    f = images.astype(jnp.float32) @ w_eff.T + b.astype(jnp.float32)
    if no_imgnorm:
        return f
    norm = jnp.sqrt(jnp.sum(f * f, axis=-1, keepdims=True)) + 1e-8
    return f / norm


def reference_forward_mixed(images, v, g, b, *, no_imgnorm=False):
    # Same arithmetic the kernel performs: bf16 MXU operands, f32 accumulate,
    # f32 epilogue.
    v32 = v.astype(jnp.float32)
    scale = jnp.asarray(g, jnp.float32) / jnp.sqrt(jnp.sum(v32 * v32))
    w_bf16 = (scale * v32).astype(jnp.bfloat16)
    x_bf16 = images.astype(jnp.bfloat16)
    f = jnp.dot(x_bf16, w_bf16.T, preferred_element_type=jnp.float32)
    f = f + b.astype(jnp.float32)
    if no_imgnorm:
        return f
    ss = jnp.sum(f * f, axis=-1, keepdims=True)
    return f * jax.lax.rsqrt(ss + 1e-16)


if __name__ == "__main__":
    key = jax.random.PRNGKey(0)
    k1, k2, k3 = jax.random.split(key, 3)

    # Test 1: ragged rows (N=14), sub-128 dims, explicit tm=8 -> multi-block
    # pipelined path with a partial last row block + lane padding of D and E.
    batch, n_regions, img_dim, embed_size = 2, 7, 32, 48
    images = jax.random.normal(k1, (batch, n_regions, img_dim), dtype=jnp.float32)
    v = jax.random.normal(k2, (embed_size, img_dim), dtype=jnp.float32) * 0.1
    b = jax.random.normal(k3, (embed_size,), dtype=jnp.float32) * 0.1
    g = jnp.sqrt(jnp.sum(v * v))     # weight_norm init: g = ||V||_F (dim=None)

    w_prep, b_prep, e_sz = prepare_encoder_params(v, g, b)
    out = jax.block_until_ready(
        encoder_image_forward(images, w_prep, b_prep, e_sz, tm=8))
    assert out.shape == (batch, n_regions, embed_size)
    ref_m = reference_forward_mixed(images, v, g, b)
    ref_f = reference_forward_f32(images, v, g, b)
    assert jnp.allclose(out, ref_m, atol=2e-3, rtol=2e-3), float(
        jnp.max(jnp.abs(out - ref_m)))
    assert jnp.allclose(out, ref_f, atol=3e-2, rtol=3e-2), float(
        jnp.max(jnp.abs(out - ref_f)))

    # Test 1b: no_imgnorm path.
    out_nn = jax.block_until_ready(
        encoder_image_forward(images, w_prep, b_prep, e_sz, no_imgnorm=True, tm=8))
    ref_nn = reference_forward_mixed(images, v, g, b, no_imgnorm=True)
    assert jnp.allclose(out_nn, ref_nn, atol=2e-3, rtol=2e-3), float(
        jnp.max(jnp.abs(out_nn - ref_nn)))

    # Test 2: force the K-tiled (streamed-weight) path: Dp=256 -> tk=128, n_k=2.
    img_dim2, embed_size2, n2 = 256, 128, 24
    kk1, kk2, kk3 = jax.random.split(jax.random.PRNGKey(1), 3)
    images2 = jax.random.normal(kk1, (n2, img_dim2), dtype=jnp.float32)
    v2 = jax.random.normal(kk2, (embed_size2, img_dim2), dtype=jnp.float32) * 0.05
    b2 = jax.random.normal(kk3, (embed_size2,), dtype=jnp.float32) * 0.05
    g2 = jnp.sqrt(jnp.sum(v2 * v2))
    w2, bb2, e2 = prepare_encoder_params(v2, g2, b2)
    out2 = jax.block_until_ready(
        encoder_image_forward(images2, w2, bb2, e2,
                              weight_vmem_cap_bytes=64 * 1024))   # force K tiling
    assert out2.shape == (n2, embed_size2)
    ref2 = reference_forward_mixed(images2, v2, g2, b2)
    assert jnp.allclose(out2, ref2, atol=2e-3, rtol=2e-3), float(
        jnp.max(jnp.abs(out2 - ref2)))

    print("KERNEL_OK")
</pallas_src>

<mosaic_0001>
module attributes {stable_mosaic.version = 11 : i64} {
  func.func @_resident_kernel(%arg0: i32, %arg1: memref<8x128xbf16, #tpu.memory_space<vmem>>, %arg2: memref<128x128xbf16, #tpu.memory_space<vmem>>, %arg3: memref<1x128xf32, #tpu.memory_space<vmem>>, %arg4: memref<8x128xf32, #tpu.memory_space<vmem>>) attributes {dimension_semantics = [#tpu.dimension_semantics<parallel>], iteration_bounds = array<i64: 2>, scalar_prefetch = 0 : i64, scratch_operands = 0 : i64, tpu.core_type = #tpu.core_type<tc>, window_params = [{transform_indices = @transform_0, window_bounds = array<i64: 8, 128>}, {pipeline_mode = #tpu.pipeline_mode<synchronous>, transform_indices = @transform_1, window_bounds = array<i64: 128, 128>}, {pipeline_mode = #tpu.pipeline_mode<synchronous>, transform_indices = @transform_2, window_bounds = array<i64: 1, 128>}, {transform_indices = @transform_3, window_bounds = array<i64: 8, 128>}]} {
    %c0 = arith.constant 0 : index
    %c0_0 = arith.constant 0 : index
    %0 = vector.load %arg1[%c0, %c0_0] : memref<8x128xbf16, #tpu.memory_space<vmem>>, vector<8x128xbf16>
    %c0_1 = arith.constant 0 : index
    %c0_2 = arith.constant 0 : index
    %1 = vector.load %arg2[%c0_1, %c0_2] : memref<128x128xbf16, #tpu.memory_space<vmem>>, vector<128x128xbf16>
    %cst = arith.constant dense<0.000000e+00> : vector<8x128xf32>
    %2 = tpu.matmul %0, %1, %cst {dimension_numbers = #tpu.dot_dimension_numbers<[1], [0], [0], [1], [0, 0, 1, 1], [], []>} : vector<8x128xbf16>, vector<128x128xbf16>, vector<8x128xf32> -> vector<8x128xf32>
    %c0_3 = arith.constant 0 : index
    %c0_4 = arith.constant 0 : index
    %3 = vector.load %arg3[%c0_3, %c0_4] : memref<1x128xf32, #tpu.memory_space<vmem>>, vector<1x128xf32>
    %4 = vector.broadcast %3 : vector<1x128xf32> to vector<8x128xf32>
    %5 = arith.addf %2, %4 : vector<8x128xf32>
    %6 = arith.mulf %5, %5 : vector<8x128xf32>
    %cst_5 = arith.constant dense<0.000000e+00> : vector<8xf32>
    %7 = vector.multi_reduction <add>, %6, %cst_5 [1] : vector<8x128xf32> to vector<8xf32>
    %8 = vector.shape_cast %7 : vector<8xf32> to vector<8x1xf32>
    %cst_6 = arith.constant 1.000000e-16 : f32
    %9 = vector.broadcast %cst_6 : f32 to vector<8x1xf32>
    %10 = arith.addf %8, %9 : vector<8x1xf32>
    %11 = math.rsqrt %10 : vector<8x1xf32>
    %12 = vector.broadcast %11 : vector<8x1xf32> to vector<8x128xf32>
    %13 = arith.mulf %5, %12 : vector<8x128xf32>
    %c0_7 = arith.constant 0 : index
    %c0_8 = arith.constant 0 : index
    %14 = vector.load %arg4[%c0_7, %c0_8] : memref<8x128xf32, #tpu.memory_space<vmem>>, vector<8x128xf32>
    tpu.vector_store %arg4[%c0_7, %c0_8], %13 {strides = array<i32>} : memref<8x128xf32, #tpu.memory_space<vmem>>, vector<8x128xf32>,
    return
  }
  func.func @transform_0(%arg0: i32) -> (i32, i32) {
    %c0_i32 = arith.constant 0 : i32
    %c0_i32_0 = arith.constant 0 : i32
    return %arg0, %c0_i32 : i32, i32
  }
  func.func @transform_1(%arg0: i32) -> (i32, i32) {
    %c0_i32 = arith.constant 0 : i32
    %c0_i32_0 = arith.constant 0 : i32
    %c0_i32_1 = arith.constant 0 : i32
    return %c0_i32, %c0_i32_0 : i32, i32
  }
  func.func @transform_2(%arg0: i32) -> (i32, i32) {
    %c0_i32 = arith.constant 0 : i32
    %c0_i32_0 = arith.constant 0 : i32
    %c0_i32_1 = arith.constant 0 : i32
    return %c0_i32, %c0_i32_0 : i32, i32
  }
  func.func @transform_3(%arg0: i32) -> (i32, i32) {
    %c0_i32 = arith.constant 0 : i32
    %c0_i32_0 = arith.constant 0 : i32
    return %arg0, %c0_i32 : i32, i32
  }
}

</mosaic_0001>

<bundles_post_ra>
// kernel: tpu_custom_call.1
= control target key start
LH: loop header
LB: loop body
LE: loop exit
PB: predicated region body
PF: predicated region fallthrough
CT: control target
= control target key end

     0   :  { %8 = vsyncpa [#allocation3], 0  ;;  %s898_s0 = inlined_call_operand.hbm [shape: bf16[14,128], index: 0, kind: input, shape index: {}]   ;;  %s899_s1 = inlined_call_operand.hbm [shape: bf16[128,128], index: 1, kind: input, shape index: {}]   ;;  %s900_s2 = inlined_call_operand.vmem [shape: f32[1,128], index: 2, kind: input, shape index: {}]   ;;  %s901_s3 = inlined_call_operand.hbm [shape: f32[14,128], index: 3, kind: output, shape index: {}]  }
   0x1   :  { %10 = vsyncpa [#allocation3 + $0x1], 0 }
   0x2   :  { %11 = vsyncpa [#allocation6], 0 }
   0x3   :  { %12 = vsyncpa [#allocation4], 0 }
   0x4   :  { %14 = vsyncpa [#allocation4 + $0x1], 0  ;;  %s695_s12 = smov 0   ;;  %s697_s13 = smov 0  }
   0x5   :  { %s699_s14 = smov 0   ;;  %s701_s15 = smov 0  }
   0x6 LB: > { %s716_s16 = sadd.s32 4294967295, %s666_s15   ;;  %s415_s17 = sadd.s32 4294967294, %s666_s15   ;;  %s666_s15 = sphi %s701_s15, %s921_s15   ;;  %s662_s14 = sphi %s699_s14, %s920_s14   ;;  %s658_s13 = sphi %s697_s13, %s919_s13   ;;  %s654_s12 = sphi %s695_s12, %s918_s12  }
   0x7   : > { %p40_p0 = scmp.ne.s32.totalorder %s658_s13, %s654_s12  ;;  %p902_p1 = scmp.eq.s32.totalorder %s716_s16, 0 }
   0x8   : > { %p112_p3 = scmp.eq.s32.totalorder %s415_s17, 1  ;;  %p416_p5 = scmp.ge.s32.totalorder %s666_s15, 1 }
   0x9   : > { %p725_p4 = por %p902_p1, %p40_p0  ;;  %p119_p7 = scmp.lt.s32.totalorder %s666_s15, 3 }
   0xa   : > { %p730_p6 = por %p112_p3, %p40_p0  ;;  %s668_s21 = smov [#allocation5]  }
   0xb   : > { %s905_s18 = scalar_select %p725_p4, 1, 0 }
   0xc   : > { %s906_s19 = scalar_select %p730_p6, 1, 0 }
   0xd   : > { %p735_p8 = pnand %p416_p5, %p119_p7  ;;  %s131_s22 = sshll.u32 %s668_s21, 4  ;;  %s739_s22 = int_to_ptr.vmem [resolvable:$true] %s131_s22 }
   0xe   : > { %s751_s24 = sadd.s32 1, %s666_s15   ;;  %s27_s25 = sadd.s32 1, %s662_s14 }
   0xf   : > { %s907_s20 = scalar_select %p735_p8, 1, 0 }
  0x10   : > { %p475_p9 = pneg %p735_p8  ;;  %s24_s26 = ssub.s32 %s666_s15, %s751_s24 }
  0x11   : > { %s538_s29 = scalar_lea.hbm %s899_s1, 1024 }
  0x12   : > { %p746_p11 = pnand %p475_p9, %p902_p1  ;;  %p539_p12 = scmp.ne.s32.totalorder %s899_s1, %s538_s29 }
  0x13   : > { %p545_p5 = scmp.lt.u32.totalorder %s538_s29, %s899_s1 }
  0x14   : > { %p540_p13 = pneg %p746_p11 }
  0x16   : > { %p541_p0 = pnand %p540_p13, %p539_p12 }
  0x18   : > { %p542_p3 = pneg %p541_p0 }
  0x1a   : > { %p547_p7 = pnand %p545_p5, %p542_p3 }
  0x1c   : > { %550 = shalt.err (!%p547_p7)
}
  0x1d   : > { %s551_s7 = scalar_lea.vmem %s739_s22, 1024  ;;  %p559_p2 = scmp.lt.s32.totalorder %s739_s22, %s739_s22 }
  0x1e   : > { %p552_p9 = scmp.ne.s32.totalorder %s739_s22, %s551_s7  ;;  %p560_p6 = scmp.lt.s32.totalorder %s551_s7, %s551_s7 }
  0x20   : > { %p554_p10 = pnand %p552_p9, %p540_p13  ;;  %p561_p4 = por %p560_p6, %p559_p2 }
  0x22   : > { %p555_p1 = pneg %p554_p10 }
  0x24   : > { %p562_p8 = pnand %p561_p4, %p555_p1 }
  0x26   : > { %565 = shalt.err (!%p562_p8)
}
  0x27   : > { %s669_s8 = smov 64   ;;  %s670_s9 = smov 4  }
  0x28   : > { %478 = dma.hbm_to_vmem [thread:$0]  (!%p746_p11), %s899_s1, 1024, %s739_s22, [#allocation6], %s669_s8, %s669_s8, %s670_s9  }
  0x29   : > { %p25_p2 = scmp.eq.s32.totalorder %s24_s26, 0  ;;  %p34_p1 = scmp.ne.s32.totalorder %s662_s14, %s658_s13 }
  0x2a   : > { %p35_p4 = scmp.eq.s32.totalorder %s666_s15, 0  ;;  %p488_p6 = scmp.lt.s32.totalorder %s666_s15, 2 }
  0x2b   : > { %s782_s17 = scalar_select %p25_p2, %s662_s14, %s27_s25  }
  0x2c   : > { %p36_p8 = por %p35_p4, %p34_p1  ;;  %p909_p10 = scmp.eq.s32.totalorder %s716_s16, 1 }
  0x2d   : > { %s148_s27 = sand.u32 1, %s662_s14   ;;  %s420_s28 = sshll.u32 %s666_s15, 6 }
  0x2e   : > { %p786_p12 = por %p909_p10, %p34_p1  ;;  %s419_s29 = sshll.u32 %s148_s27, 2 }
  0x2f   : > { %s795_s4 = scalar_lea.hbm %s898_s0, %s420_s28  ;;  %s152_s22 = scalar_lea.vmem [#allocation2], %s419_s29 }
  0x30   : > { %s159_s25 = sshll.u32 %s152_s22, 4  ;;  %p797_p11 = pnand %p488_p6, %p36_p8  ;;  %s801_s25 = int_to_ptr.vmem [resolvable:$true] %s159_s25 }
  0x31   : > { %s149_s5 = scalar_lea.sflag [#allocation3], %s148_s27  ;;  %s566_s6 = scalar_lea.hbm %s795_s4, 64 }
  0x32   : > { %p567_p13 = scmp.ne.s32.totalorder %s795_s4, %s566_s6  ;;  %p568_p0 = pneg %p797_p11 }
  0x33   : > { %s571_s9 = scalar_lea.hbm %s898_s0, 128  ;;  %p572_p7 = scmp.lt.u32.totalorder %s795_s4, %s898_s0 }
  0x34   : > { %p569_p3 = pnand %p568_p0, %p567_p13  ;;  %p573_p9 = scmp.lt.u32.totalorder %s571_s9, %s566_s6 }
  0x35   : > { %p575_p1 = scmp.lt.u32.totalorder %s566_s6, %s795_s4 }
  0x36   : > { %p570_p5 = pneg %p569_p3  ;;  %p574_p2 = por %p573_p9, %p572_p7 }
  0x38   : > { %p576_p4 = por %p575_p1, %p574_p2 }
  0x3a   : > { %p577_p6 = pnand %p576_p4, %p570_p5 }
  0x3c   : > { %580 = shalt.err (!%p577_p6)
}
  0x3d   : > { %s581_s27 = scalar_lea.vmem %s801_s25, 64  ;;  %s671_s28 = smov [#allocation2]  }
  0x3e   : > { %p582_p8 = scmp.ne.s32.totalorder %s801_s25, %s581_s27  ;;  %s586_s29 = sshll.u32 %s671_s28, 4  ;;  %s587_s29 = int_to_ptr.vmem [resolvable:$false] %s586_s29 }
  0x3f   : > { %s588_s23 = scalar_lea.vmem %s587_s29, 128  ;;  %p589_p3 = scmp.lt.s32.totalorder %s801_s25, %s587_s29 }
  0x40   : > { %p584_p10 = pnand %p582_p8, %p568_p0  ;;  %p590_p7 = scmp.lt.s32.totalorder %s588_s23, %s581_s27 }
  0x42   : > { %p585_p13 = pneg %p584_p10  ;;  %p591_p9 = por %p590_p7, %p589_p3 }
  0x44   : > { %p592_p2 = pnand %p591_p9, %p585_p13 }
  0x46   : > { %595 = shalt.err (!%p592_p2)
}
  0x47   : > { %482 = dma.hbm_to_vmem [thread:$0]  (!%p797_p11), %s795_s4, 64, %s801_s25, %s149_s5  }
  0x48   : > { %p912_p5 = scmp.ne.s32.totalorder %s907_s20, 0 }
  0x49   : > { %s831_s30 = sand.u32 (!%p912_p5), 1, %s658_s13   ;;  %p913_p0 = scmp.ne.s32.totalorder (!%p912_p5), %s905_s18, 0 }
  0x4a   : > { %168 = sbr.rel (%p912_p5) target bundleno = 505 (0x1f9), region = 32  ;;  %s422_s22 = sshll.u32 (!%p912_p5), %s831_s30, 2 }
  0x4b   : > { %s171_s6 = scalar_lea.sflag (!%p912_p5), [#allocation3], %s831_s30  ;;  %s835_s7 = scalar_lea.vmem (!%p912_p5), [#allocation2], %s422_s22 }
  0x51   : > { %641 = dma.done.wait (%p913_p0), %s171_s6, 64  }
  0x52   : > { %643 = vsyncadd (%p913_p0), %s171_s6, 4294967232  ;;  %p914_p11 = scmp.eq.s32.totalorder %s716_s16, 0 }
  0x54   : > { %645 = dma.done.wait (%p914_p11), [#allocation6], 1024   ;;  %p915_p1 = pmov %p914_p11 }
  0x55   : > { %v672_v0 = vmov 0.0   ;;  %vm673_vm0 = vmmov 0   ;;  %v528_v1 = vld [vmem:[#allocation5] sm:$0xff]   ;;  %v529_v2 = vld [vmem:[#allocation5 + $0x8] sm:$0xff]   ;;  %v530_v3 = vld [vmem:[#allocation5 + $0x10] sm:$0xff]   ;;  %s424_s4 = sshll.u32 %s831_s30, 3 }
  0x56   : > { %647 = vsyncadd (%p915_p1), [#allocation6], 4294966272  ;;  %447 = vmatprep.subr.bf16.mxu0 %v672_v0  ;;  %463 = vmatprep.mubr.msk.bf16.mxu0 %vm673_vm0, %v672_v0  ;;  %v531_v4 = vld [vmem:[#allocation5 + $0x18] sm:$0xff]   ;;  %v532_v5 = vld [vmem:[#allocation5 + $0x20] sm:$0xff]   ;;  %s435_s25 = sshll.u32 %s716_s16, 7  ;;  %s200_s26 = scalar_lea.vmem [#allocation7], %s424_s4 }
  0x57   : > { %448 = vmatpush3.bf16.msra.mxu0 %v528_v1  ;;  %v533_v6 = vld [vmem:[#allocation5 + $0x28] sm:$0xff]   ;;  %v534_v7 = vld [vmem:[#allocation5 + $0x30] sm:$0xff]   ;;  %v535_v8 = vld [vmem:[#allocation5 + $0x38] sm:$0xff]   ;;  %s335_s5 = sshll.u32 %s200_s26, 4  ;;  %s854_s10 = scalar_lea.hbm %s901_s3, %s435_s25  ;;  %s856_s5 = int_to_ptr.vmem [resolvable:$true] %s335_s5 }
  0x58   : > { %449 = vmatprep.subr.bf16.mxu0 %v672_v0  ;;  %v202_v9 = vld [vmem:[%s835_s7] sm:$0xf]  ;;  %s322_s11 = scalar_lea.sflag [#allocation4], %s831_s30  ;;  %s596_s27 = scalar_lea.vmem %s856_s5, 128 }
  0x59   : > { %v425_v10 = vld [vmem:[%s900_s2] ss:$0 sm:$0xff]  ;;  %p597_p4 = scmp.ne.s32.totalorder %s856_s5, %s596_s27  ;;  %s674_s16 = smov [#allocation7]  }
  0x5a   : > { %s600_s28 = sshll.u32 %s674_s16, 4  ;;  %s601_s28 = int_to_ptr.vmem [resolvable:$false] %s600_s28 }
  0x5b   : > { %450 = vmatpush3.bf16.msra.mxu0 %v529_v2  ;;  %p598_p6 = pnand %p597_p4, %p786_p12  ;;  %s602_s29 = scalar_lea.vmem %s601_s28, 256 }
  0x5c   : > { %451 = vmatprep.subr.bf16.mxu0 %v672_v0  ;;  %p603_p10 = scmp.lt.s32.totalorder %s856_s5, %s601_s28  ;;  %p604_p13 = scmp.lt.s32.totalorder %s602_s29, %s596_s27 }
  0x5d   : > { %p599_p8 = pneg %p598_p6 }
  0x5e   : > { %p605_p3 = por %p604_p13, %p603_p10 }
  0x5f   : > { %452 = vmatpush3.bf16.msra.mxu0 %v530_v3 }
  0x60   : > { %453 = vmatprep.subr.bf16.mxu0 %v672_v0  ;;  %p606_p7 = pnand %p605_p3, %p599_p8 }
  0x63   : > { %454 = vmatpush3.bf16.msra.mxu0 %v531_v4 }
  0x64   : > { %455 = vmatprep.subr.bf16.mxu0 %v672_v0 }
  0x67   : > { %456 = vmatpush3.bf16.msra.mxu0 %v532_v5 }
  0x68   : > { %457 = vmatprep.subr.bf16.mxu0 %v672_v0 }
  0x6b   : > { %458 = vmatpush3.bf16.msra.mxu0 %v533_v6 }
  0x6c   : > { %459 = vmatprep.subr.bf16.mxu0 %v672_v0 }
  0x6f   : > { %460 = vmatpush3.bf16.msra.mxu0 %v534_v7 }
  0x70   : > { %461 = vmatprep.subr.bf16.mxu0 %v672_v0 }
  0x73   : > { %462 = vmatpush3.bf16.msra.mxu0 %v535_v8 }
  0x76   : > { %464 = vmatmul.mubr.bf16.vlgmr.msra.gmra.mrb[0].mxu0 %v202_v9 }
 0x149   : > { %v308_v11 = vpop.f32.mrb[0].mxu0 }
 0x14a   : > { %v309_v12 = vadd.f32 %v425_v10, %v308_v11  ;;  %v465_v13 = vpop.f32.mrb[1].mxu0 }
 0x14b   : > { %v311_v14 = vpop.f32.mrb[2].mxu0 }
 0x14c   : > { %v466_v15 = vpop.f32.mrb[3].mxu0  ;;  %v314_v16 = vmul.f32 %v309_v12, %v309_v12 }
 0x14e   : > { %315 = vadd.xlane.f32.xlu0 %v314_v16 }
 0x1db   : > { %v316_v17 = vpop.xlane.xlu0 %315 }
 0x1dc   : > { %v317_v18 = vadd.f32 1e-16, %v316_v17 }
 0x1de   : > { %536 = vrsqrt.f32 %v317_v18 }
 0x1e8   : > { %v537_v19 = vpop.eup %536 }
 0x1e9   : > { %v319_v20 = vmul.f32 %v537_v19, %v309_v12 }
 0x1eb   : > { %320 = vst [vmem:[%s200_s26] sm:$0xff] %v319_v20 }
 0x1ec   : > { %609 = shalt.err (!%p606_p7)
}
 0x1ed   : > { %s610_s23 = scalar_lea.hbm %s854_s10, 128  ;;  %s614_s6 = scalar_lea.hbm %s901_s3, 256 }
 0x1ee   : > { %p611_p9 = scmp.ne.s32.totalorder %s854_s10, %s610_s23  ;;  %p615_p0 = scmp.lt.u32.totalorder %s854_s10, %s901_s3 }
 0x1ef   : > { %p616_p11 = scmp.lt.u32.totalorder %s614_s6, %s610_s23  ;;  %p618_p4 = scmp.lt.u32.totalorder %s610_s23, %s854_s10 }
 0x1f0   : > { %p612_p2 = pnand %p611_p9, %p786_p12 }
 0x1f1   : > { %p617_p1 = por %p616_p11, %p615_p0 }
 0x1f2   : > { %p613_p5 = pneg %p612_p2 }
 0x1f3   : > { %p619_p6 = por %p618_p4, %p617_p1 }
 0x1f5   : > { %p620_p8 = pnand %p619_p6, %p613_p5 }
 0x1f7   : > { %623 = shalt.err (!%p620_p8)
}
 0x1f8   : > { %473 = dma.vmem_to_hbm [thread:$0]  (%p786_p12), %s856_s5, 128, %s854_s10, %s322_s11  }
 0x1f9 PF: > { %s347_s20 = sand.u32 1, %s654_s12   ;;  %p916_p10 = scmp.ne.s32.totalorder %s906_s19, 0 }
 0x1fa   : > { %p917_p13 = scmp.ge.s32.totalorder %s666_s15, 2  ;;  %s348_s4 = scalar_lea.sflag [#allocation4], %s347_s20 }
 0x1fc   : > { %p484_p3 = pnand %p917_p13, %p916_p10 }
 0x1fe   : > { %649 = dma.done.wait (!%p484_p3), %s348_s4, 128  }
 0x1ff   : > { %651 = vsyncadd (!%p484_p3), %s348_s4, 4294967168  ;;  %p17_p7 = scmp.ge.s32.totalorder %s751_s24, 4   ;;  %s918_s12 = smov %s658_s13 }
 0x200   : > { %s919_s13 = smov %s662_s14  ;;  %s920_s14 = smov %s782_s17 }
 0x201   : > { %s921_s15 = smov %s751_s24  ;;  %19 = sbr.rel (!%p17_p7) target bundleno = 6 (0x6), region = 81 }
 0x208   :  { %353 = vsyncpa [#allocation3], 1 }
 0x209   :  { %355 = vsyncpa [#allocation3 + $0x1], 1 }
 0x20a   :  { %356 = vsyncpa [#allocation6], 1 }
 0x20b   :  { %357 = vsyncpa [#allocation4], 1 }
 0x20c   :  { %359 = vsyncpa [#allocation4 + $0x1], 1 }

</bundles_post_ra>
